<compile_context>
chip_gen: v7x
topology: tpu7x:2x2x1
jax: 0.10.0
libtpu: 0.0.40
codegen_flags: <defaults>
</compile_context>

<pallas_src>
import functools

import jax
import jax.numpy as jnp
from jax.experimental import pallas as pl
from jax.experimental.pallas import tpu as pltpu


def _double_sigmoid_kernel(x_ref, o_ref, *, shift, magnitude, compute_dtype):
    x = x_ref[...]
    if x.dtype != compute_dtype:
        x = x.astype(compute_dtype)
    half_m = 0.5 * magnitude            # folded Python constants
    half_c = 0.5 * magnitude * shift
    hmx = half_m * x                    # shared m*x/2
    # Exact identity: sigmoid(z) = 0.5*(1 + tanh(z/2))
    #   sigmoid(-m(x+s)) + sigmoid(m(x-s))
    #     = 1 + 0.5*(tanh(m(x-s)/2) - tanh(m(x+s)/2))
    out = 1.0 + 0.5 * (jnp.tanh(hmx - half_c) - jnp.tanh(hmx + half_c))
    o_ref[...] = out.astype(o_ref.dtype)


def _pick_lane(total):
    # Widest multiple-of-128 lane width that divides the element count.
    for cand in (8192, 4096, 2048, 1024, 512, 256, 128):
        if total % cand == 0:
            return cand
    return None


def _sublane_multiple(dtype):
    # Native sublane packing: 8 rows for 32-bit, 16 for bf16, 32 for int8/fp8.
    return max(8, 32 // jnp.dtype(dtype).itemsize)


def _compute_dtype_for(x_dtype):
    # bf16 VPU/EUP exist on v6e/v7x; v5-class chips need the f32 upcast.
    if x_dtype == jnp.bfloat16:
        try:
            kind = jax.devices()[0].device_kind.lower()
        except Exception:
            kind = ""
        if "v5" not in kind:
            return jnp.bfloat16
    return jnp.float32


def _run_double_sigmoid_2d(x2, shift, magnitude, target_block_bytes):
    rows, lane = x2.shape
    dtype = x2.dtype
    itemsize = jnp.dtype(dtype).itemsize
    sub = _sublane_multiple(dtype)

    # Cap block bytes so 4x block (in+out, double-buffered) stays well within
    # v7x's 64 MiB VMEM while still amortizing the ~0.35 us/step overhead.
    tbb = min(int(target_block_bytes), 8 * 1024 * 1024)
    tile_rows = max(sub, (tbb // (lane * itemsize) // sub) * sub)

    if tile_rows >= rows:
        if rows >= 2 * sub:
            # Keep >= 2 grid steps so the "parallel" axis can shard across
            # both TensorCores on v7x instead of leaving one idle.
            half = -(-rows // 2)
            tile_rows = -(-half // sub) * sub
        else:
            tile_rows = rows            # full-extent block (allowed even if <8)
    grid = (pl.cdiv(rows, tile_rows),)  # ragged last block is masked (safe:
                                        # elementwise, OOB rows never written)

    block_bytes = tile_rows * lane * itemsize
    vmem_limit = int(min(48 << 20, max(16 << 20, 4 * block_bytes + (4 << 20))))

    n = rows * lane
    cost = pl.CostEstimate(
        flops=6 * n,
        transcendentals=2 * n,
        bytes_accessed=2 * n * itemsize,
    )

    kernel = functools.partial(
        _double_sigmoid_kernel,
        shift=float(shift),
        magnitude=float(magnitude),
        compute_dtype=_compute_dtype_for(dtype),
    )

    return pl.pallas_call(
        kernel,
        out_shape=jax.ShapeDtypeStruct((rows, lane), dtype),
        grid_spec=pltpu.PrefetchScalarGridSpec(
            num_scalar_prefetch=0,
            grid=grid,
            in_specs=[pl.BlockSpec((tile_rows, lane), lambda i: (i, 0))],
            out_specs=pl.BlockSpec((tile_rows, lane), lambda i: (i, 0)),
        ),
        compiler_params=pltpu.CompilerParams(
            dimension_semantics=("parallel",),
            vmem_limit_bytes=vmem_limit,
        ),
        cost_estimate=cost,
    )(x2)


def double_sigmoid(x, shift, magnitude, *, target_block_bytes=4 * 1024 * 1024):
    """Apply DoubleSigmoid elementwise via a lane-dense Pallas TPU kernel."""
    orig_shape = x.shape
    orig_dtype = x.dtype
    total = 1
    for d in orig_shape:
        total *= int(d)
    if total == 0:
        return x

    lane = _pick_lane(total)
    if lane is not None:
        x2 = x.reshape(total // lane, lane)
        out = _run_double_sigmoid_2d(x2, shift, magnitude, target_block_bytes)
        return out.reshape(orig_shape)

    # Rare fallback: element count not a multiple of 128.  Run the kernel on
    # the lane-aligned head and handle the sub-128 tail with plain jnp; this
    # avoids a full-tensor pad + trim round trip (extra HBM pass).
    lane = 128
    flat = x.reshape(-1)
    main = (total // lane) * lane
    pieces = []
    if main > 0:
        head = _run_double_sigmoid_2d(
            flat[:main].reshape(main // lane, lane),
            shift, magnitude, target_block_bytes)
        pieces.append(head.reshape(-1))
    tail = flat[main:].astype(jnp.float32)
    tail_out = (jax.nn.sigmoid(-magnitude * (tail + shift))
                + jax.nn.sigmoid(magnitude * (tail - shift))).astype(orig_dtype)
    pieces.append(tail_out)
    out = jnp.concatenate(pieces) if len(pieces) > 1 else pieces[0]
    return out.reshape(orig_shape)


def double_sigmoid_ref(x, shift, magnitude):
    xf = x.astype(jnp.float32)
    return (jax.nn.sigmoid(-magnitude * (xf + shift))
            + jax.nn.sigmoid(magnitude * (xf - shift))).astype(x.dtype)


if __name__ == "__main__":
    key = jax.random.PRNGKey(0)
    # Module hyperparameters (from __init__ signature).
    shift = 0.5
    magnitude = 10.0

    # Primary check: small NCHW input consistent with a conv-style forward.
    x = jax.random.normal(key, (2, 4, 16, 16), dtype=jnp.float32)
    y = jax.block_until_ready(double_sigmoid(x, shift, magnitude))
    y_ref = double_sigmoid_ref(x, shift, magnitude)
    assert y.shape == x.shape and y.dtype == x.dtype
    assert jnp.allclose(y, y_ref, atol=1e-6, rtol=1e-6)

    # Secondary check: size large enough to exercise the multi-step grid
    # (>= 2 blocks -> dual-TC split path on v7x).
    k2 = jax.random.PRNGKey(1)
    x2 = jax.random.normal(k2, (4, 8, 64, 128), dtype=jnp.float32)
    y2 = jax.block_until_ready(double_sigmoid(x2, shift, magnitude))
    assert jnp.allclose(y2, double_sigmoid_ref(x2, shift, magnitude),
                        atol=1e-6, rtol=1e-6)

    # Tertiary check: element count not a multiple of 128 (fallback path).
    k3 = jax.random.PRNGKey(2)
    x3 = jax.random.normal(k3, (2, 3, 5, 7), dtype=jnp.float32)
    y3 = jax.block_until_ready(double_sigmoid(x3, shift, magnitude))
    assert jnp.allclose(y3, double_sigmoid_ref(x3, shift, magnitude),
                        atol=1e-6, rtol=1e-6)

    print("KERNEL_OK")
</pallas_src>

<mosaic_0001>
module attributes {stable_mosaic.version = 11 : i64} {
  func.func @_double_sigmoid_kernel(%arg0: i32, %arg1: memref<1x2048xf32, #tpu.memory_space<vmem>>, %arg2: memref<1x2048xf32, #tpu.memory_space<vmem>>) attributes {dimension_semantics = [#tpu.dimension_semantics<parallel>], iteration_bounds = array<i64: 1>, scalar_prefetch = 0 : i64, scratch_operands = 0 : i64, tpu.core_type = #tpu.core_type<tc>, window_params = [{transform_indices = @transform_0, window_bounds = array<i64: 1, 2048>}, {transform_indices = @transform_1, window_bounds = array<i64: 1, 2048>}]} {
    %c0 = arith.constant 0 : index
    %c0_0 = arith.constant 0 : index
    %0 = vector.load %arg1[%c0, %c0_0] : memref<1x2048xf32, #tpu.memory_space<vmem>>, vector<1x2048xf32>
    %cst = arith.constant 5.000000e+00 : f32
    %1 = vector.broadcast %cst : f32 to vector<1x2048xf32>
    %2 = arith.mulf %1, %0 : vector<1x2048xf32>
    %cst_1 = arith.constant 2.500000e+00 : f32
    %3 = vector.broadcast %cst_1 : f32 to vector<1x2048xf32>
    %4 = arith.subf %2, %3 : vector<1x2048xf32>
    %5 = math.tanh %4 : vector<1x2048xf32>
    %cst_2 = arith.constant 2.500000e+00 : f32
    %6 = vector.broadcast %cst_2 : f32 to vector<1x2048xf32>
    %7 = arith.addf %2, %6 : vector<1x2048xf32>
    %8 = math.tanh %7 : vector<1x2048xf32>
    %9 = arith.subf %5, %8 : vector<1x2048xf32>
    %cst_3 = arith.constant 5.000000e-01 : f32
    %10 = vector.broadcast %cst_3 : f32 to vector<1x2048xf32>
    %11 = arith.mulf %10, %9 : vector<1x2048xf32>
    %cst_4 = arith.constant 1.000000e+00 : f32
    %12 = vector.broadcast %cst_4 : f32 to vector<1x2048xf32>
    %13 = arith.addf %12, %11 : vector<1x2048xf32>
    %c0_5 = arith.constant 0 : index
    %c0_6 = arith.constant 0 : index
    %14 = vector.load %arg2[%c0_5, %c0_6] : memref<1x2048xf32, #tpu.memory_space<vmem>>, vector<1x2048xf32>
    tpu.vector_store %arg2[%c0_5, %c0_6], %13 {strides = array<i32>} : memref<1x2048xf32, #tpu.memory_space<vmem>>, vector<1x2048xf32>,
    return
  }
  func.func @transform_0(%arg0: i32) -> (i32, i32) {
    %c0_i32 = arith.constant 0 : i32
    %c0_i32_0 = arith.constant 0 : i32
    return %arg0, %c0_i32 : i32, i32
  }
  func.func @transform_1(%arg0: i32) -> (i32, i32) {
    %c0_i32 = arith.constant 0 : i32
    %c0_i32_0 = arith.constant 0 : i32
    return %arg0, %c0_i32 : i32, i32
  }
}

</mosaic_0001>

<bundles_post_ra>
// kernel: tpu_custom_call.1
= control target key start
LH: loop header
LB: loop body
LE: loop exit
PB: predicated region body
PF: predicated region fallthrough
CT: control target
= control target key end

     0   :  { %6 = vsyncpa [#allocation3], 0  ;;  %s152_s0 = inlined_call_operand.hbm [shape: f32[1,2048], index: 0, kind: input, shape index: {}]   ;;  %s153_s1 = inlined_call_operand.hbm [shape: f32[1,2048], index: 1, kind: output, shape index: {}]  }
   0x1   :  { %7 = vsyncpa [#allocation4], 0  ;;  %s116_s6 = smov [#allocation2]   ;;  %s68_s10 = scalar_lea.hbm %s152_s0, 256 }
   0x2   :  { %s14_s7 = sshll.u32 %s116_s6, 4  ;;  %p69_p0 = scmp.ne.s32.totalorder %s152_s0, %s68_s10  ;;  %s15_s7 = int_to_ptr.vmem [resolvable:$true] %s14_s7 }
   0x3   :  { %p72_p1 = scmp.lt.u32.totalorder %s68_s10, %s152_s0 }
   0x5   :  { %p74_p2 = pnand %p72_p1, %p69_p0 }
   0x7   :  { %77 = shalt.err (!%p74_p2)
}
   0x8   :  { %s78_s15 = scalar_lea.vmem %s15_s7, 256  ;;  %p83_p4 = scmp.lt.s32.totalorder %s15_s7, %s15_s7 }
   0x9   :  { %p79_p3 = scmp.ne.s32.totalorder %s15_s7, %s78_s15  ;;  %p84_p5 = scmp.lt.s32.totalorder %s78_s15, %s78_s15 }
   0xb   :  { %p85_p6 = por %p84_p5, %p83_p4 }
   0xd   :  { %p86_p7 = pnand %p85_p6, %p79_p3 }
   0xf   :  { %89 = shalt.err (!%p86_p7)
}
  0x10   :  { %17 = dma.hbm_to_vmem [thread:$0]  %s152_s0, 256, %s15_s7, [#allocation3]  }
  0x11   :  { %112 = dma.done.wait [#allocation3], 256  }
  0x12   :  { %113 = vsyncadd [#allocation3], 4294967040  ;;  %v21_v0 = vld [vmem:[#allocation2] sm:$0xff]  ;;  %v22_v1 = vld [vmem:[#allocation2 + $0x8] sm:$0xff]  ;;  %s117_s0 = smov [#allocation5]  }
  0x13   :  { %v23_v2 = vmul.f32 5.0, %v21_v0  ;;  %v24_v3 = vmul.f32 5.0, %v22_v1  ;;  %s47_s18 = sshll.u32 %s117_s0, 4  ;;  %s48_s18 = int_to_ptr.vmem [resolvable:$true] %s47_s18 }
  0x14   :  { %s90_s19 = scalar_lea.vmem %s48_s18, 256  ;;  %p95_p9 = scmp.lt.s32.totalorder %s48_s18, %s48_s18 }
  0x15   :  { %v56_v4 = vadd.f32 -2.5, %v23_v2  ;;  %v29_v5 = vadd.f32 2.5, %v23_v2  ;;  %v57_v6 = vadd.f32 -2.5, %v24_v3  ;;  %v30_v7 = vadd.f32 2.5, %v24_v3  ;;  %p91_p8 = scmp.ne.s32.totalorder %s48_s18, %s90_s19  ;;  %p96_p10 = scmp.lt.s32.totalorder %s90_s19, %s90_s19 }
  0x17   :  { %60 = vtanh.f32 %v56_v4  ;;  %p97_p11 = por %p96_p10, %p95_p9 }
  0x18   :  { %62 = vtanh.f32 %v29_v5 }
  0x19   :  { %64 = vtanh.f32 %v57_v6  ;;  %p98_p12 = pnand %p97_p11, %p91_p8 }
  0x1a   :  { %66 = vtanh.f32 %v30_v7 }
  0x21   :  { %v61_v8 = vpop.eup %60 }
  0x22   :  { %v63_v9 = vpop.eup %62 }
  0x23   :  { %v65_v10 = vpop.eup %64  ;;  %v33_v11 = vsub.f32 %v61_v8, %v63_v9 }
  0x24   :  { %v67_v12 = vpop.eup %66 }
  0x25   :  { %v35_v13 = vmul.f32 0.5, %v33_v11  ;;  %v34_v14 = vsub.f32 %v65_v10, %v67_v12 }
  0x27   :  { %v37_v15 = vadd.f32 1.0, %v35_v13  ;;  %v36_v16 = vmul.f32 0.5, %v34_v14 }
  0x29   :  { %39 = vst [vmem:[#allocation5] sm:$0xff] %v37_v15  ;;  %v38_v17 = vadd.f32 1.0, %v36_v16 }
  0x2b   :  { %40 = vst [vmem:[#allocation5 + $0x8] sm:$0xff] %v38_v17 }
  0x2c   :  { %101 = shalt.err (!%p98_p12)
}
  0x2d   :  { %s102_s22 = scalar_lea.hbm %s153_s1, 256 }
  0x2e   :  { %p103_p13 = scmp.ne.s32.totalorder %s153_s1, %s102_s22  ;;  %p106_p0 = scmp.lt.u32.totalorder %s102_s22, %s153_s1 }
  0x30   :  { %p108_p1 = pnand %p106_p0, %p103_p13 }
  0x32   :  { %111 = shalt.err (!%p108_p1)
}
  0x33   :  { %50 = dma.vmem_to_hbm [thread:$0]  %s48_s18, 256, %s153_s1, [#allocation4]  }
  0x34   :  { %114 = dma.done.wait [#allocation4], 256  }
  0x35   :  { %115 = vsyncadd [#allocation4], 4294967040 }
  0x36   :  { %54 = vsyncpa [#allocation3], 1 }
  0x37   :  { %55 = vsyncpa [#allocation4], 1 }

</bundles_post_ra>
